<compile_context>
chip_gen: v7x
topology: tpu7x:2x2x1
jax: 0.10.0
libtpu: 0.0.40
codegen_flags: <defaults>
</compile_context>

<pallas_src>
import functools

import jax
import jax.numpy as jnp
from jax.experimental import pallas as pl
from jax.experimental.pallas import tpu as pltpu

_MIB = 1024 * 1024


def _round_up(x, m):
    return ((x + m - 1) // m) * m


def _cdiv(a, b):
    return -(-a // b)


def _vmem_capacity_bytes():
    """Physical VMEM per TensorCore; conservative 64 MiB (v7x) if the query fails."""
    try:
        cap = getattr(pltpu.get_tpu_info(), "vmem_capacity_bytes", None)
        if cap:
            return int(cap)
    except Exception:
        pass
    return 64 * _MIB


def _choose_view(shape, max_lane_k):
    """Pick a lane-dense 2-D (R, K) view of the flat tensor (K a multiple of 128)."""
    total = 1
    for d in shape:
        total *= int(d)
    limit = min(int(max_lane_k), total)
    best = None
    for k in range(128, limit + 1, 128):          # prefer K that keeps R >= 8
        if total % k == 0 and total // k >= 8:
            best = k
    if best is None:
        for k in range(128, limit + 1, 128):
            if total % k == 0:
                best = k
    if best is not None:
        return total // best, best
    # TODO(synk): totals with no 128-multiple divisor keep a non-lane-dense view
    # (masked stores); a K(lane)-tiled variant for that rare case is not implemented.
    if len(shape) >= 2:
        k = int(shape[-1]) * int(shape[-2])
    else:
        k = total
    return total // k, k


# ---------------------------------------------------------------------------
# Fused single-pass kernel: reduce + normalize on a tensor resident in VMEM.
# Grid-less call => single-buffered whole-array blocks.
# ---------------------------------------------------------------------------
def _fused_kernel(x_ref, o_ref):
    x = x_ref[...].astype(jnp.float32)
    mn = jnp.min(x)
    mx = jnp.max(x)
    scale = 1.0 / (mx - mn)                       # one exact divide per tensor
    o_ref[...] = ((x - mn) * scale).astype(o_ref.dtype)


# ---------------------------------------------------------------------------
# Pass 1 (two-pass path): per-core global min/max.  Grid = (core, tile); each
# tile folds into an (8, K) accumulator with element-wise VPU min/max; the
# cross-lane/sublane reduction to scalars runs once per core at its last step.
# Tail rows beyond R are masked with +/-inf (no wrapper-side padding).
# ---------------------------------------------------------------------------
def _reduce_kernel(x_ref, min_ref, max_ref, acc_min, acc_max, *,
                   total_rows, row_tile, tiles_per_core, last_start_tile,
                   needs_mask):
    t = pl.program_id(1)

    @pl.when(t == 0)
    def _():
        acc_min[...] = jnp.full_like(acc_min, jnp.inf)
        acc_max[...] = jnp.full_like(acc_max, -jnp.inf)

    rt, k = x_ref.shape
    x = x_ref[...].astype(jnp.float32)

    if needs_mask:
        c = pl.program_id(0)
        tile_idx = jnp.minimum(c * tiles_per_core, last_start_tile) + t
        rows = tile_idx * row_tile + jax.lax.broadcasted_iota(jnp.int32, (rt, k), 0)
        valid = rows < total_rows
        x_min = jnp.where(valid, x, jnp.inf)
        x_max = jnp.where(valid, x, -jnp.inf)
    else:
        x_min = x
        x_max = x

    # Layout-preserving sublane-group split; min/max over axis 0 is pure VPU.
    x_min = x_min.reshape(rt // 8, 8, k)
    x_max = x_max.reshape(rt // 8, 8, k)
    acc_min[...] = jnp.minimum(acc_min[...], jnp.min(x_min, axis=0))
    acc_max[...] = jnp.maximum(acc_max[...], jnp.max(x_max, axis=0))

    @pl.when(t == tiles_per_core - 1)
    def _():
        min_ref[...] = jnp.broadcast_to(jnp.min(acc_min[...]), (1, 8, 128))
        max_ref[...] = jnp.broadcast_to(jnp.max(acc_max[...]), (1, 8, 128))


# ---------------------------------------------------------------------------
# Pass 2 (two-pass path): streaming normalize, (min, scale) from SMEM scalars.
# ---------------------------------------------------------------------------
def _normalize_kernel(stats_ref, x_ref, o_ref):
    mn = stats_ref[0]
    scale = stats_ref[1]
    o_ref[...] = ((x_ref[...].astype(jnp.float32) - mn) * scale).astype(o_ref.dtype)


def min_max_normalization(img, *, force_two_pass=False, max_lane_k=4096,
                          tile_target_bytes=None):
    """JAX/Pallas equivalent of MinMaxNormalization.forward (output float32)."""
    shape = img.shape
    R, K = _choose_view(shape, max_lane_k)
    x2 = img.reshape(R, K)                        # free view of contiguous data

    in_elem = img.dtype.itemsize
    out_dtype = jnp.float32
    vmem_cap = _vmem_capacity_bytes()
    grant_cap = (vmem_cap // 8) * 7               # leave ~12% headroom for the compiler

    in_bytes = R * K * in_elem
    out_bytes = R * K * 4

    # ------------------- fused single-pass path (2x HBM traffic) ------------
    # Budget in + out + an elementwise temp (2*out) so the threshold is
    # compile-safe on every generation (incl. v7x's 64 MiB VMEM).
    fused_need = in_bytes + 2 * out_bytes + 2 * _MIB
    if not force_two_pass and fused_need <= grant_cap:
        vlim = int(min(grant_cap, max(fused_need + 4 * _MIB, 32 * _MIB)))
        out2 = pl.pallas_call(
            _fused_kernel,
            out_shape=jax.ShapeDtypeStruct((R, K), out_dtype),
            compiler_params=pltpu.CompilerParams(vmem_limit_bytes=vlim),
        )(x2)
        return out2.reshape(shape)

    # ------------------- tiled two-pass path (streaming, 3x HBM) ------------
    if tile_target_bytes is None:
        p1_tile_bytes = 8 * _MIB                  # pass 1 double-buffers only the input
        p2_tile_bytes = 4 * _MIB                  # pass 2 holds 2x in + 2x out buffers
    else:
        p1_tile_bytes = p2_tile_bytes = int(tile_target_bytes)

    acc_bytes = 2 * 8 * K * 4                     # two (8, K) f32 accumulators
    # TODO(synk): if K is huge and not 128-divisible (rare fallback view), the
    # (8, K) accumulator / 8-row slab may exceed the VMEM grant; K(lane) tiling
    # is not implemented for that case.

    def pick_rt(target_bytes, per_row_bytes, fixed_bytes):
        rt = max(8, (int(target_bytes) // (K * 4)) // 8 * 8)
        rt = min(rt, _round_up(R, 8))
        cap_rows = (grant_cap - fixed_bytes) // max(per_row_bytes, 1)
        rt = min(rt, max(8, (int(cap_rows) // 8) * 8))
        return int(rt)

    rt1 = pick_rt(p1_tile_bytes, 2 * K * in_elem, acc_bytes + 1 * _MIB)
    rt2 = pick_rt(p2_tile_bytes, 2 * K * (in_elem + 4), 1 * _MIB)

    n_tiles = _cdiv(R, rt1)
    n_cores = 2 if n_tiles >= 2 else 1            # split pass 1 across v7x's 2 TCs
    tiles_per_core = _cdiv(n_tiles, n_cores)
    last_start_tile = max(n_tiles - tiles_per_core, 0)
    needs_mask = (R % rt1) != 0

    vlim1 = int(min(grant_cap,
                    max(2 * rt1 * K * in_elem + acc_bytes + 4 * _MIB, 32 * _MIB)))
    vlim2 = int(min(grant_cap,
                    max(2 * rt2 * K * (in_elem + 4) + 4 * _MIB, 32 * _MIB)))

    reduce_kernel = functools.partial(
        _reduce_kernel, total_rows=R, row_tile=rt1,
        tiles_per_core=tiles_per_core, last_start_tile=last_start_tile,
        needs_mask=needs_mask)

    def x1_map(c, t):
        # Odd tile counts: the last core starts earlier and re-processes one tile
        # (duplicates are harmless for min/max); block indices never go fully OOB.
        return (jnp.minimum(c * tiles_per_core, last_start_tile) + t, 0)

    # --- pass 1: global min / max, per-core partials ------------------------
    mins, maxs = pl.pallas_call(
        reduce_kernel,
        out_shape=(jax.ShapeDtypeStruct((n_cores, 8, 128), jnp.float32),
                   jax.ShapeDtypeStruct((n_cores, 8, 128), jnp.float32)),
        grid=(n_cores, tiles_per_core),
        in_specs=[pl.BlockSpec((rt1, K), x1_map)],
        out_specs=(pl.BlockSpec((1, 8, 128), lambda c, t: (c, 0, 0)),
                   pl.BlockSpec((1, 8, 128), lambda c, t: (c, 0, 0))),
        scratch_shapes=[pltpu.VMEM((8, K), jnp.float32),
                        pltpu.VMEM((8, K), jnp.float32)],
        compiler_params=pltpu.CompilerParams(
            dimension_semantics=("parallel", "arbitrary"),
            vmem_limit_bytes=vlim1),
    )(x2)

    # Tiny glue: combine per-core partials, one exact divide per tensor.
    mn = jnp.min(mins)
    mx = jnp.max(maxs)
    scale = 1.0 / (mx - mn)
    stats = jnp.stack([mn, scale]).astype(jnp.float32)

    # --- pass 2: elementwise normalize (pure VPU, "parallel" grid) ----------
    out2 = pl.pallas_call(
        _normalize_kernel,
        out_shape=jax.ShapeDtypeStruct((R, K), out_dtype),
        grid=(_cdiv(R, rt2),),
        in_specs=[pl.BlockSpec(memory_space=pltpu.SMEM),
                  pl.BlockSpec((rt2, K), lambda i: (i, 0))],
        out_specs=pl.BlockSpec((rt2, K), lambda i: (i, 0)),
        compiler_params=pltpu.CompilerParams(
            dimension_semantics=("parallel",),
            vmem_limit_bytes=vlim2),
    )(stats, x2)

    return out2.reshape(shape)


if __name__ == "__main__":
    def reference(x):
        img = x.astype(jnp.float32) * 255.0
        return (img - jnp.min(img)) / (jnp.max(img) - jnp.min(img))

    key = jax.random.PRNGKey(0)
    k0, k1, k2 = jax.random.split(key, 3)

    # Module-sized input (NCHW): fused single-pass path.
    x = jax.random.uniform(k0, (2, 4, 16, 16), dtype=jnp.float32)
    out = jax.block_until_ready(min_max_normalization(x))
    assert out.shape == x.shape and out.dtype == jnp.float32
    assert jnp.allclose(out, reference(x), atol=1e-5, rtol=1e-5)

    # Two-pass path: multi-tile grid split across the core axis, no masking.
    x2 = jax.random.normal(k1, (4, 8, 32, 32), dtype=jnp.float32)
    out2 = jax.block_until_ready(
        min_max_normalization(x2, force_two_pass=True, max_lane_k=512,
                              tile_target_bytes=64 * 1024))
    assert jnp.allclose(out2, reference(x2), atol=1e-5, rtol=1e-5)

    # Two-pass path with tail-row masking (R=15, 8-row tiles) and uneven output blocks.
    x3 = jax.random.uniform(k2, (3, 5, 16, 16), dtype=jnp.float32)
    out3 = jax.block_until_ready(
        min_max_normalization(x3, force_two_pass=True, max_lane_k=256,
                              tile_target_bytes=8 * 1024))
    assert jnp.allclose(out3, reference(x3), atol=1e-5, rtol=1e-5)

    print("KERNEL_OK")
</pallas_src>

<mosaic_0001>
module attributes {stable_mosaic.version = 11 : i64} {
  func.func @_fused_kernel(%arg0: memref<8x256xf32, #tpu.memory_space<vmem>>, %arg1: memref<8x256xf32, #tpu.memory_space<vmem>>) attributes {dimension_semantics = [], scalar_prefetch = 0 : i64, scratch_operands = 0 : i64, tpu.core_type = #tpu.core_type<tc>} {
    %c0 = arith.constant 0 : index
    %c0_0 = arith.constant 0 : index
    %0 = vector.load %arg0[%c0, %c0_0] : memref<8x256xf32, #tpu.memory_space<vmem>>, vector<8x256xf32>
    %1 = vector.shape_cast %0 : vector<8x256xf32> to vector<1x8x256xf32>
    %cst = arith.constant dense<0x7F800000> : vector<1xf32>
    %2 = vector.multi_reduction <minimumf>, %1, %cst [1, 2] : vector<1x8x256xf32> to vector<1xf32>
    %3 = vector.shape_cast %2 : vector<1xf32> to vector<1x1x1xf32>
    %4 = vector.extract %3[0, 0, 0] : f32 from vector<1x1x1xf32>
    %5 = vector.shape_cast %0 : vector<8x256xf32> to vector<1x8x256xf32>
    %cst_1 = arith.constant dense<0xFF800000> : vector<1xf32>
    %6 = vector.multi_reduction <maximumf>, %5, %cst_1 [1, 2] : vector<1x8x256xf32> to vector<1xf32>
    %7 = vector.shape_cast %6 : vector<1xf32> to vector<1x1x1xf32>
    %8 = vector.extract %7[0, 0, 0] : f32 from vector<1x1x1xf32>
    %9 = arith.subf %8, %4 : f32
    %cst_2 = arith.constant 1.000000e+00 : f32
    %10 = arith.divf %cst_2, %9 : f32
    %11 = vector.broadcast %4 : f32 to vector<8x256xf32>
    %12 = arith.subf %0, %11 : vector<8x256xf32>
    %13 = vector.broadcast %10 : f32 to vector<8x256xf32>
    %14 = arith.mulf %12, %13 : vector<8x256xf32>
    %c0_3 = arith.constant 0 : index
    %c0_4 = arith.constant 0 : index
    %15 = vector.load %arg1[%c0_3, %c0_4] : memref<8x256xf32, #tpu.memory_space<vmem>>, vector<8x256xf32>
    tpu.vector_store %arg1[%c0_3, %c0_4], %14 {strides = array<i32>} : memref<8x256xf32, #tpu.memory_space<vmem>>, vector<8x256xf32>,
    return
  }
}

</mosaic_0001>

<bundles_post_ra>
// kernel: tpu_custom_call.1
= control target key start
LH: loop header
LB: loop body
LE: loop exit
PB: predicated region body
PF: predicated region fallthrough
CT: control target
= control target key end

     0   :  { %6 = vsyncpa [#allocation3], 0  ;;  %s164_s0 = inlined_call_operand.hbm [shape: f32[8,256], index: 0, kind: input, shape index: {}]   ;;  %s165_s1 = inlined_call_operand.hbm [shape: f32[8,256], index: 1, kind: output, shape index: {}]  }
   0x1   :  { %7 = vsyncpa [#allocation4], 0  ;;  %s128_s6 = smov [#allocation2]   ;;  %s80_s10 = scalar_lea.hbm %s164_s0, 256 }
   0x2   :  { %s14_s7 = sshll.u32 %s128_s6, 4  ;;  %p81_p0 = scmp.ne.s32.totalorder %s164_s0, %s80_s10  ;;  %s15_s7 = int_to_ptr.vmem [resolvable:$true] %s14_s7 }
   0x3   :  { %p84_p1 = scmp.lt.u32.totalorder %s80_s10, %s164_s0 }
   0x5   :  { %p86_p2 = pnand %p84_p1, %p81_p0 }
   0x7   :  { %89 = shalt.err (!%p86_p2)
}
   0x8   :  { %s90_s15 = scalar_lea.vmem %s15_s7, 256  ;;  %p95_p4 = scmp.lt.s32.totalorder %s15_s7, %s15_s7 }
   0x9   :  { %p91_p3 = scmp.ne.s32.totalorder %s15_s7, %s90_s15  ;;  %p96_p5 = scmp.lt.s32.totalorder %s90_s15, %s90_s15 }
   0xb   :  { %p97_p6 = por %p96_p5, %p95_p4 }
   0xd   :  { %p98_p7 = pnand %p97_p6, %p91_p3 }
   0xf   :  { %101 = shalt.err (!%p98_p7)
}
  0x10   :  { %17 = dma.hbm_to_vmem [thread:$0]  %s164_s0, 256, %s15_s7, [#allocation3]  }
  0x11   :  { %124 = dma.done.wait [#allocation3], 256  }
  0x12   :  { %125 = vsyncadd [#allocation3], 4294967040  ;;  %v21_v0 = vld [vmem:[#allocation2] sm:$0xff]  ;;  %v22_v1 = vld [vmem:[#allocation2 + $0x8] sm:$0xff]  ;;  %s129_s20 = smov [#allocation5]  }
  0x13   :  { %v23_v2 = vmin.f32 %v21_v0, %v22_v1  ;;  %v33_v3 = vmax.f32 %v21_v0, %v22_v1  ;;  %s61_s21 = sshll.u32 %s129_s20, 4  ;;  %s62_s21 = int_to_ptr.vmem [resolvable:$true] %s61_s21 }
  0x14   :  { %s102_s23 = scalar_lea.vmem %s62_s21, 256  ;;  %p107_p9 = scmp.lt.s32.totalorder %s62_s21, %s62_s21 }
  0x15   :  { %24 = vmin.xlane.f32.xlu0 %v23_v2  ;;  %p103_p8 = scmp.ne.s32.totalorder %s62_s21, %s102_s23  ;;  %p108_p10 = scmp.lt.s32.totalorder %s102_s23, %s102_s23 }
  0x17   :  { %p109_p11 = por %p108_p10, %p107_p9 }
  0x19   :  { %34 = vmax.xlane.f32.xlu0 %v33_v3  ;;  %p110_p12 = pnand %p109_p11, %p103_p8 }
  0xa2   :  { %v25_v4 = vpop.xlane.xlu0 %24 }
  0xa3   :  { %v26_v5 = vrot.slane %v25_v4, 4 }
  0xa5   :  { %v27_v6 = vmin.f32 %v25_v4, %v26_v5 }
  0xa6   :  { %v35_v7 = vpop.xlane.xlu0 %34 }
  0xa7   :  { %v28_v8 = vrot.slane %v27_v6, 2  ;;  %v36_v9 = vrot.slane %v35_v7, 4 }
  0xa9   :  { %v37_v10 = vmax.f32 %v35_v7, %v36_v9  ;;  %v29_v11 = vmin.f32 %v27_v6, %v28_v8 }
  0xab   :  { %v38_v12 = vrot.slane %v37_v10, 2  ;;  %v30_v13 = vrot.slane %v29_v11, 1 }
  0xad   :  { %v39_v14 = vmax.f32 %v37_v10, %v38_v12  ;;  %v31_v15 = vmin.f32 %v29_v11, %v30_v13 }
  0xaf   :  { %70 = vpush %v31_v15  ;;  %v40_v16 = vrot.slane %v39_v14, 1 }
  0xb1   :  { %v41_v17 = vmax.f32 %v39_v14, %v40_v16 }
  0xb3   :  { %72 = vpush %v41_v17 }
  0xe0   :  { %s71_s0 = spop %70 }
  0xe1   :  { %v47_v20 = vstv %s71_s0 }
  0xe2   :  { %v48_v21 = vsub.f32 %v21_v0, %v47_v20  ;;  %v49_v22 = vsub.f32 %v22_v1, %v47_v20 }
  0xe4   :  { %s73_s18 = spop %72 }
  0xe5   :  { %s43_s19 = ssub.f32 %s73_s18, %s71_s0 }
  0xe7   :  { %v44_v18 = vstv %s43_s19 }
  0xe8   :  { %78 = vrcp.f32 %v44_v18 }
  0xf2   :  { %v79_v19 = vpop.eup %78 }
  0xf3   :  { %74 = vpush %v79_v19 }
 0x124   :  { %s75_s22 = spop %74 }
 0x125   :  { %v50_v23 = vstv %s75_s22 }
 0x126   :  { %v51_v24 = vmul.f32 %v50_v23, %v48_v21  ;;  %v52_v25 = vmul.f32 %v50_v23, %v49_v22 }
 0x128   :  { %53 = vst [vmem:[#allocation5] sm:$0xff] %v51_v24  ;;  %54 = vst [vmem:[#allocation5 + $0x8] sm:$0xff] %v52_v25 }
 0x129   :  { %113 = shalt.err (!%p110_p12)
}
 0x12a   :  { %s114_s26 = scalar_lea.hbm %s165_s1, 256 }
 0x12b   :  { %p115_p13 = scmp.ne.s32.totalorder %s165_s1, %s114_s26  ;;  %p118_p0 = scmp.lt.u32.totalorder %s114_s26, %s165_s1 }
 0x12d   :  { %p120_p1 = pnand %p118_p0, %p115_p13 }
 0x12f   :  { %123 = shalt.err (!%p120_p1)
}
 0x130   :  { %64 = dma.vmem_to_hbm [thread:$0]  %s62_s21, 256, %s165_s1, [#allocation4]  }
 0x131   :  { %126 = dma.done.wait [#allocation4], 256  }
 0x132   :  { %127 = vsyncadd [#allocation4], 4294967040 }
 0x133   :  { %68 = vsyncpa [#allocation3], 1 }
 0x134   :  { %69 = vsyncpa [#allocation4], 1 }

</bundles_post_ra>
